<compile_context>
chip_gen: v7x
topology: tpu7x:2x2x1
jax: 0.10.0
libtpu: 0.0.40
codegen_flags: <defaults>
</compile_context>

<pallas_src>
import functools
import math

import jax
import jax.numpy as jnp
import numpy as np
from jax import lax
from jax.experimental import pallas as pl
from jax.experimental.pallas import tpu as pltpu

LN_EPS = 1e-5   # torch.nn.LayerNorm default


def _round_up(x, m):
    return ((x + m - 1) // m) * m


def _mlp_kernel(x_ref,
                w1_ref, b1_ref, g1_ref, be1_ref,
                w2_ref, b2_ref, g2_ref, be2_ref,
                w3_ref, b3_ref,
                o_ref,
                *, apply_tanh: bool, mxu_dtype):
    # Params loaded once per grid step (VMEM-resident across the batch grid;
    # w1/w2/w3 are already in mxu_dtype, biases / LN params stay f32).
    w1 = w1_ref[...]; b1 = b1_ref[...]; g1 = g1_ref[...]; be1 = be1_ref[...]
    w2 = w2_ref[...]; b2 = b2_ref[...]; g2 = g2_ref[...]; be2 = be2_ref[...]
    w3 = w3_ref[...]; b3 = b3_ref[...]

    x = x_ref[...]

    def mm(a_f32, w):
        # bf16 (or f32) operands on the MXU, f32 accumulation.
        return jnp.dot(a_f32.astype(mxu_dtype), w,
                       preferred_element_type=jnp.float32)

    def layer_norm(h, g, be):
        # Two-pass, numerically stable LayerNorm, all in f32.  The cross-lane
        # reductions go to the XLU and rsqrt to the EUP - free filler slots.
        n = h.shape[-1]
        mu = jnp.sum(h, axis=-1, keepdims=True) * (1.0 / n)
        d = h - mu
        var = jnp.sum(d * d, axis=-1, keepdims=True) * (1.0 / n)
        return d * lax.rsqrt(var + LN_EPS) * g + be

    # ---- layer_1 + layer_norm_1 + relu ----
    h = mm(x, w1) + b1
    h = jnp.maximum(layer_norm(h, g1, be1), 0.0)

    # ---- layer_2 + layer_norm_2 + relu ----
    h = mm(h, w2) + b2
    h = jnp.maximum(layer_norm(h, g2, be2), 0.0)

    # ---- layer_3 (+ optional last_activation); narrow output, no padding ----
    out = mm(h, w3) + b3
    if apply_tanh:
        out = jnp.tanh(out)
    o_ref[...] = out.astype(o_ref.dtype)


def default_nn_forward(x, params, *, last_activation_tanh=False,
                       batch_tile=4096, mxu_dtype=jnp.bfloat16):
    """Fused DefaultNN forward pass as a batch-tiled Pallas kernel.

    x: [B, input_dims] float32
    params: dict with w1[in,l1], b1[1,l1], g1[1,l1], be1[1,l1],
            w2[l1,l2], b2[1,l2], g2[1,l2], be2[1,l2],
            w3[l2,out], b3[1,out]   (all float32)
    """
    B, in_dims = x.shape
    out_dims = params["w3"].shape[1]

    # Balanced batch tiling: amortise grid-step overhead (large tiles), keep
    # batch padding to at most a handful of rows, and - when B allows - use
    # >= 2 grid steps so the "parallel" axis shards across both v7x cores.
    n_tiles = max(1, math.ceil(B / batch_tile))
    if n_tiles == 1 and B >= 16:
        n_tiles = 2
    tb = _round_up(math.ceil(B / n_tiles), 8)
    grid_b = math.ceil(B / tb)
    b_pad = grid_b * tb
    x_p = jnp.pad(x, ((0, b_pad - B), (0, 0))) if b_pad != B else x

    # MXU operands in bf16 (cast once here; negligible, and fused under jit).
    w1 = params["w1"].astype(mxu_dtype)
    w2 = params["w2"].astype(mxu_dtype)
    w3 = params["w3"].astype(mxu_dtype)

    def const_spec(a):
        # Whole-array block, same block index every grid step -> stays
        # resident in VMEM (no re-DMA per step).
        return pl.BlockSpec(a.shape, lambda i: (0,) * a.ndim)

    in_specs = [
        pl.BlockSpec((tb, in_dims), lambda i: (i, 0)),
        const_spec(w1), const_spec(params["b1"]),
        const_spec(params["g1"]), const_spec(params["be1"]),
        const_spec(w2), const_spec(params["b2"]),
        const_spec(params["g2"]), const_spec(params["be2"]),
        const_spec(w3), const_spec(params["b3"]),
    ]
    # Narrow (un-padded) output block: last dim == full array dim, so the
    # (8,128) rule is satisfied and HBM writeback is only out_dims columns.
    out_specs = pl.BlockSpec((tb, out_dims), lambda i: (i, 0))

    out = pl.pallas_call(
        functools.partial(_mlp_kernel,
                          apply_tanh=last_activation_tanh,
                          mxu_dtype=mxu_dtype),
        out_shape=jax.ShapeDtypeStruct((b_pad, out_dims), jnp.float32),
        grid=(grid_b,),
        in_specs=in_specs,
        out_specs=out_specs,
        compiler_params=pltpu.CompilerParams(
            dimension_semantics=("parallel",)),   # megacore on v7x
    )(x_p,
      w1, params["b1"], params["g1"], params["be1"],
      w2, params["b2"], params["g2"], params["be2"],
      w3, params["b3"])

    return out[:B] if b_pad != B else out


def init_default_nn_params(key, input_dims, layer_1_dims, layer_2_dims, output_dims):
    """Mimics DefaultNN.__init__ weight init (deterministic given `key`).

    PyTorch init_weights uses bound = 1/sqrt(weight.size()[0]) where
    nn.Linear.weight is [out, in] -> bound = 1/sqrt(out_dims); layer_3 uses
    bound = 0.003.  LayerNorm starts at gamma=1, beta=0.
    """
    ks = jax.random.split(key, 6)

    def uni(k, shape, bound):
        return jax.random.uniform(k, shape, jnp.float32, -bound, bound)

    b1 = 1.0 / np.sqrt(layer_1_dims)
    b2 = 1.0 / np.sqrt(layer_2_dims)
    b3 = 0.003

    return {
        # stored as [in, out] (transposed vs torch) for x @ W in-kernel
        "w1": uni(ks[0], (input_dims, layer_1_dims), b1),
        "b1": uni(ks[1], (1, layer_1_dims), b1),
        "g1": jnp.ones((1, layer_1_dims), jnp.float32),
        "be1": jnp.zeros((1, layer_1_dims), jnp.float32),
        "w2": uni(ks[2], (layer_1_dims, layer_2_dims), b2),
        "b2": uni(ks[3], (1, layer_2_dims), b2),
        "g2": jnp.ones((1, layer_2_dims), jnp.float32),
        "be2": jnp.zeros((1, layer_2_dims), jnp.float32),
        "w3": uni(ks[4], (layer_2_dims, output_dims), b3),
        "b3": uni(ks[5], (1, output_dims), b3),
    }


def _reference_forward(x, p, last_activation_tanh=False, mxu_dtype=jnp.float32):
    """Pure-JAX reference; mxu_dtype lets us mirror the kernel's bf16 dots."""
    def dot(a, w):
        return jnp.dot(a.astype(mxu_dtype), w.astype(mxu_dtype),
                       preferred_element_type=jnp.float32)

    def ln(h, g, b):
        n = h.shape[-1]
        mu = jnp.sum(h, axis=-1, keepdims=True) * (1.0 / n)
        d = h - mu
        var = jnp.sum(d * d, axis=-1, keepdims=True) * (1.0 / n)
        return d * lax.rsqrt(var + LN_EPS) * g + b

    h = jnp.maximum(ln(dot(x, p["w1"]) + p["b1"], p["g1"], p["be1"]), 0.0)
    h = jnp.maximum(ln(dot(h, p["w2"]) + p["b2"], p["g2"], p["be2"]), 0.0)
    out = dot(h, p["w3"]) + p["b3"]
    if last_activation_tanh:
        out = jnp.tanh(out)
    return out


if __name__ == "__main__":
    key = jax.random.PRNGKey(0)
    k_param, k_x1, k_x2 = jax.random.split(key, 3)

    # Small DDPG-ish shapes: obs dim 16, hidden 32/32, action dim 4.
    input_dims, l1, l2, out_dims = 16, 32, 32, 4
    params = init_default_nn_params(k_param, input_dims, l1, l2, out_dims)

    # Whole wrapper (pad + pallas_call + slice) under jit.
    fwd = jax.jit(functools.partial(default_nn_forward, last_activation_tanh=True))

    # --- case 1: tiny batch (single grid step) ---
    B = 8
    x = jax.random.normal(k_x1, (B, input_dims), jnp.float32)
    y = jax.block_until_ready(fwd(x, params))
    assert y.shape == (B, out_dims)

    # Tight check against a reference with identical bf16-dot structure.
    y_bf = _reference_forward(x, params, True, mxu_dtype=jnp.bfloat16)
    np.testing.assert_allclose(np.asarray(y), np.asarray(y_bf), rtol=1e-3, atol=1e-4)
    # Loose check against the pure-f32 reference (bf16 MXU operand error).
    y_f32 = _reference_forward(x, params, True, mxu_dtype=jnp.float32)
    np.testing.assert_allclose(np.asarray(y), np.asarray(y_f32), rtol=5e-2, atol=5e-3)

    # --- case 2: ragged batch exercising multi-tile grid + row padding ---
    B2 = 37
    x2 = jax.random.normal(k_x2, (B2, input_dims), jnp.float32)
    y2 = jax.block_until_ready(fwd(x2, params))
    assert y2.shape == (B2, out_dims)
    y2_bf = _reference_forward(x2, params, True, mxu_dtype=jnp.bfloat16)
    np.testing.assert_allclose(np.asarray(y2), np.asarray(y2_bf), rtol=1e-3, atol=1e-4)

    print("KERNEL_OK")
</pallas_src>

<mosaic_0001>
module attributes {stable_mosaic.version = 11 : i64} {
  func.func @_mlp_kernel(%arg0: i32, %arg1: memref<8x16xf32, #tpu.memory_space<vmem>>, %arg2: memref<16x32xbf16, #tpu.memory_space<vmem>>, %arg3: memref<1x32xf32, #tpu.memory_space<vmem>>, %arg4: memref<1x32xf32, #tpu.memory_space<vmem>>, %arg5: memref<1x32xf32, #tpu.memory_space<vmem>>, %arg6: memref<32x32xbf16, #tpu.memory_space<vmem>>, %arg7: memref<1x32xf32, #tpu.memory_space<vmem>>, %arg8: memref<1x32xf32, #tpu.memory_space<vmem>>, %arg9: memref<1x32xf32, #tpu.memory_space<vmem>>, %arg10: memref<32x4xbf16, #tpu.memory_space<vmem>>, %arg11: memref<1x4xf32, #tpu.memory_space<vmem>>, %arg12: memref<8x4xf32, #tpu.memory_space<vmem>>) attributes {dimension_semantics = [#tpu.dimension_semantics<parallel>], iteration_bounds = array<i64: 1>, scalar_prefetch = 0 : i64, scratch_operands = 0 : i64, tpu.core_type = #tpu.core_type<tc>, window_params = [{transform_indices = @transform_0, window_bounds = array<i64: 8, 16>}, {pipeline_mode = #tpu.pipeline_mode<synchronous>, transform_indices = @transform_1, window_bounds = array<i64: 16, 32>}, {pipeline_mode = #tpu.pipeline_mode<synchronous>, transform_indices = @transform_2, window_bounds = array<i64: 1, 32>}, {pipeline_mode = #tpu.pipeline_mode<synchronous>, transform_indices = @transform_3, window_bounds = array<i64: 1, 32>}, {pipeline_mode = #tpu.pipeline_mode<synchronous>, transform_indices = @transform_4, window_bounds = array<i64: 1, 32>}, {pipeline_mode = #tpu.pipeline_mode<synchronous>, transform_indices = @transform_5, window_bounds = array<i64: 32, 32>}, {pipeline_mode = #tpu.pipeline_mode<synchronous>, transform_indices = @transform_6, window_bounds = array<i64: 1, 32>}, {pipeline_mode = #tpu.pipeline_mode<synchronous>, transform_indices = @transform_7, window_bounds = array<i64: 1, 32>}, {pipeline_mode = #tpu.pipeline_mode<synchronous>, transform_indices = @transform_8, window_bounds = array<i64: 1, 32>}, {pipeline_mode = #tpu.pipeline_mode<synchronous>, transform_indices = @transform_9, window_bounds = array<i64: 32, 4>}, {pipeline_mode = #tpu.pipeline_mode<synchronous>, transform_indices = @transform_10, window_bounds = array<i64: 1, 4>}, {transform_indices = @transform_11, window_bounds = array<i64: 8, 4>}]} {
    %c0 = arith.constant 0 : index
    %c0_0 = arith.constant 0 : index
    %0 = vector.load %arg2[%c0, %c0_0] : memref<16x32xbf16, #tpu.memory_space<vmem>>, vector<16x32xbf16>
    %c0_1 = arith.constant 0 : index
    %c0_2 = arith.constant 0 : index
    %1 = vector.load %arg3[%c0_1, %c0_2] : memref<1x32xf32, #tpu.memory_space<vmem>>, vector<1x32xf32>
    %c0_3 = arith.constant 0 : index
    %c0_4 = arith.constant 0 : index
    %2 = vector.load %arg4[%c0_3, %c0_4] : memref<1x32xf32, #tpu.memory_space<vmem>>, vector<1x32xf32>
    %c0_5 = arith.constant 0 : index
    %c0_6 = arith.constant 0 : index
    %3 = vector.load %arg5[%c0_5, %c0_6] : memref<1x32xf32, #tpu.memory_space<vmem>>, vector<1x32xf32>
    %c0_7 = arith.constant 0 : index
    %c0_8 = arith.constant 0 : index
    %4 = vector.load %arg6[%c0_7, %c0_8] : memref<32x32xbf16, #tpu.memory_space<vmem>>, vector<32x32xbf16>
    %c0_9 = arith.constant 0 : index
    %c0_10 = arith.constant 0 : index
    %5 = vector.load %arg7[%c0_9, %c0_10] : memref<1x32xf32, #tpu.memory_space<vmem>>, vector<1x32xf32>
    %c0_11 = arith.constant 0 : index
    %c0_12 = arith.constant 0 : index
    %6 = vector.load %arg8[%c0_11, %c0_12] : memref<1x32xf32, #tpu.memory_space<vmem>>, vector<1x32xf32>
    %c0_13 = arith.constant 0 : index
    %c0_14 = arith.constant 0 : index
    %7 = vector.load %arg9[%c0_13, %c0_14] : memref<1x32xf32, #tpu.memory_space<vmem>>, vector<1x32xf32>
    %c0_15 = arith.constant 0 : index
    %c0_16 = arith.constant 0 : index
    %8 = vector.load %arg10[%c0_15, %c0_16] : memref<32x4xbf16, #tpu.memory_space<vmem>>, vector<32x4xbf16>
    %c0_17 = arith.constant 0 : index
    %c0_18 = arith.constant 0 : index
    %9 = vector.load %arg11[%c0_17, %c0_18] : memref<1x4xf32, #tpu.memory_space<vmem>>, vector<1x4xf32>
    %c0_19 = arith.constant 0 : index
    %c0_20 = arith.constant 0 : index
    %10 = vector.load %arg1[%c0_19, %c0_20] : memref<8x16xf32, #tpu.memory_space<vmem>>, vector<8x16xf32>
    %11 = arith.truncf %10 : vector<8x16xf32> to vector<8x16xbf16>
    %cst = arith.constant dense<0.000000e+00> : vector<8x32xf32>
    %12 = tpu.matmul %11, %0, %cst {dimension_numbers = #tpu.dot_dimension_numbers<[1], [0], [0], [1], [0, 0, 1, 1], [], []>} : vector<8x16xbf16>, vector<16x32xbf16>, vector<8x32xf32> -> vector<8x32xf32>
    %13 = vector.broadcast %1 : vector<1x32xf32> to vector<8x32xf32>
    %14 = arith.addf %12, %13 : vector<8x32xf32>
    %cst_21 = arith.constant dense<0.000000e+00> : vector<8xf32>
    %15 = vector.multi_reduction <add>, %14, %cst_21 [1] : vector<8x32xf32> to vector<8xf32>
    %16 = vector.shape_cast %15 : vector<8xf32> to vector<8x1xf32>
    %cst_22 = arith.constant 3.125000e-02 : f32
    %17 = vector.broadcast %cst_22 : f32 to vector<8x1xf32>
    %18 = arith.mulf %16, %17 : vector<8x1xf32>
    %19 = vector.broadcast %18 : vector<8x1xf32> to vector<8x32xf32>
    %20 = arith.subf %14, %19 : vector<8x32xf32>
    %21 = arith.mulf %20, %20 : vector<8x32xf32>
    %cst_23 = arith.constant dense<0.000000e+00> : vector<8xf32>
    %22 = vector.multi_reduction <add>, %21, %cst_23 [1] : vector<8x32xf32> to vector<8xf32>
    %23 = vector.shape_cast %22 : vector<8xf32> to vector<8x1xf32>
    %cst_24 = arith.constant 3.125000e-02 : f32
    %24 = vector.broadcast %cst_24 : f32 to vector<8x1xf32>
    %25 = arith.mulf %23, %24 : vector<8x1xf32>
    %cst_25 = arith.constant 9.99999974E-6 : f32
    %26 = vector.broadcast %cst_25 : f32 to vector<8x1xf32>
    %27 = arith.addf %25, %26 : vector<8x1xf32>
    %28 = math.rsqrt %27 : vector<8x1xf32>
    %29 = vector.broadcast %28 : vector<8x1xf32> to vector<8x32xf32>
    %30 = arith.mulf %20, %29 : vector<8x32xf32>
    %31 = vector.broadcast %2 : vector<1x32xf32> to vector<8x32xf32>
    %32 = arith.mulf %30, %31 : vector<8x32xf32>
    %33 = vector.broadcast %3 : vector<1x32xf32> to vector<8x32xf32>
    %34 = arith.addf %32, %33 : vector<8x32xf32>
    %cst_26 = arith.constant 0.000000e+00 : f32
    %35 = vector.broadcast %cst_26 : f32 to vector<8x32xf32>
    %36 = arith.maximumf %34, %35 : vector<8x32xf32>
    %37 = arith.truncf %36 : vector<8x32xf32> to vector<8x32xbf16>
    %cst_27 = arith.constant dense<0.000000e+00> : vector<8x32xf32>
    %38 = tpu.matmul %37, %4, %cst_27 {dimension_numbers = #tpu.dot_dimension_numbers<[1], [0], [0], [1], [0, 0, 1, 1], [], []>} : vector<8x32xbf16>, vector<32x32xbf16>, vector<8x32xf32> -> vector<8x32xf32>
    %39 = vector.broadcast %5 : vector<1x32xf32> to vector<8x32xf32>
    %40 = arith.addf %38, %39 : vector<8x32xf32>
    %cst_28 = arith.constant dense<0.000000e+00> : vector<8xf32>
    %41 = vector.multi_reduction <add>, %40, %cst_28 [1] : vector<8x32xf32> to vector<8xf32>
    %42 = vector.shape_cast %41 : vector<8xf32> to vector<8x1xf32>
    %cst_29 = arith.constant 3.125000e-02 : f32
    %43 = vector.broadcast %cst_29 : f32 to vector<8x1xf32>
    %44 = arith.mulf %42, %43 : vector<8x1xf32>
    %45 = vector.broadcast %44 : vector<8x1xf32> to vector<8x32xf32>
    %46 = arith.subf %40, %45 : vector<8x32xf32>
    %47 = arith.mulf %46, %46 : vector<8x32xf32>
    %cst_30 = arith.constant dense<0.000000e+00> : vector<8xf32>
    %48 = vector.multi_reduction <add>, %47, %cst_30 [1] : vector<8x32xf32> to vector<8xf32>
    %49 = vector.shape_cast %48 : vector<8xf32> to vector<8x1xf32>
    %cst_31 = arith.constant 3.125000e-02 : f32
    %50 = vector.broadcast %cst_31 : f32 to vector<8x1xf32>
    %51 = arith.mulf %49, %50 : vector<8x1xf32>
    %cst_32 = arith.constant 9.99999974E-6 : f32
    %52 = vector.broadcast %cst_32 : f32 to vector<8x1xf32>
    %53 = arith.addf %51, %52 : vector<8x1xf32>
    %54 = math.rsqrt %53 : vector<8x1xf32>
    %55 = vector.broadcast %54 : vector<8x1xf32> to vector<8x32xf32>
    %56 = arith.mulf %46, %55 : vector<8x32xf32>
    %57 = vector.broadcast %6 : vector<1x32xf32> to vector<8x32xf32>
    %58 = arith.mulf %56, %57 : vector<8x32xf32>
    %59 = vector.broadcast %7 : vector<1x32xf32> to vector<8x32xf32>
    %60 = arith.addf %58, %59 : vector<8x32xf32>
    %cst_33 = arith.constant 0.000000e+00 : f32
    %61 = vector.broadcast %cst_33 : f32 to vector<8x32xf32>
    %62 = arith.maximumf %60, %61 : vector<8x32xf32>
    %63 = arith.truncf %62 : vector<8x32xf32> to vector<8x32xbf16>
    %cst_34 = arith.constant dense<0.000000e+00> : vector<8x4xf32>
    %64 = tpu.matmul %63, %8, %cst_34 {dimension_numbers = #tpu.dot_dimension_numbers<[1], [0], [0], [1], [0, 0, 1, 1], [], []>} : vector<8x32xbf16>, vector<32x4xbf16>, vector<8x4xf32> -> vector<8x4xf32>
    %65 = vector.broadcast %9 : vector<1x4xf32> to vector<8x4xf32>
    %66 = arith.addf %64, %65 : vector<8x4xf32>
    %67 = math.tanh %66 : vector<8x4xf32>
    %c0_35 = arith.constant 0 : index
    %c0_36 = arith.constant 0 : index
    %68 = vector.load %arg12[%c0_35, %c0_36] : memref<8x4xf32, #tpu.memory_space<vmem>>, vector<8x4xf32>
    tpu.vector_store %arg12[%c0_35, %c0_36], %67 {strides = array<i32>} : memref<8x4xf32, #tpu.memory_space<vmem>>, vector<8x4xf32>,
    return
  }
  func.func @transform_0(%arg0: i32) -> (i32, i32) {
    %c0_i32 = arith.constant 0 : i32
    %c0_i32_0 = arith.constant 0 : i32
    return %arg0, %c0_i32 : i32, i32
  }
  func.func @transform_1(%arg0: i32) -> (i32, i32) {
    %c0_i32 = arith.constant 0 : i32
    %c0_i32_0 = arith.constant 0 : i32
    %c0_i32_1 = arith.constant 0 : i32
    return %c0_i32, %c0_i32_0 : i32, i32
  }
  func.func @transform_2(%arg0: i32) -> (i32, i32) {
    %c0_i32 = arith.constant 0 : i32
    %c0_i32_0 = arith.constant 0 : i32
    %c0_i32_1 = arith.constant 0 : i32
    return %c0_i32, %c0_i32_0 : i32, i32
  }
  func.func @transform_3(%arg0: i32) -> (i32, i32) {
    %c0_i32 = arith.constant 0 : i32
    %c0_i32_0 = arith.constant 0 : i32
    %c0_i32_1 = arith.constant 0 : i32
    return %c0_i32, %c0_i32_0 : i32, i32
  }
  func.func @transform_4(%arg0: i32) -> (i32, i32) {
    %c0_i32 = arith.constant 0 : i32
    %c0_i32_0 = arith.constant 0 : i32
    %c0_i32_1 = arith.constant 0 : i32
    return %c0_i32, %c0_i32_0 : i32, i32
  }
  func.func @transform_5(%arg0: i32) -> (i32, i32) {
    %c0_i32 = arith.constant 0 : i32
    %c0_i32_0 = arith.constant 0 : i32
    %c0_i32_1 = arith.constant 0 : i32
    return %c0_i32, %c0_i32_0 : i32, i32
  }
  func.func @transform_6(%arg0: i32) -> (i32, i32) {
    %c0_i32 = arith.constant 0 : i32
    %c0_i32_0 = arith.constant 0 : i32
    %c0_i32_1 = arith.constant 0 : i32
    return %c0_i32, %c0_i32_0 : i32, i32
  }
  func.func @transform_7(%arg0: i32) -> (i32, i32) {
    %c0_i32 = arith.constant 0 : i32
    %c0_i32_0 = arith.constant 0 : i32
    %c0_i32_1 = arith.constant 0 : i32
    return %c0_i32, %c0_i32_0 : i32, i32
  }
  func.func @transform_8(%arg0: i32) -> (i32, i32) {
    %c0_i32 = arith.constant 0 : i32
    %c0_i32_0 = arith.constant 0 : i32
    %c0_i32_1 = arith.constant 0 : i32
    return %c0_i32, %c0_i32_0 : i32, i32
  }
  func.func @transform_9(%arg0: i32) -> (i32, i32) {
    %c0_i32 = arith.constant 0 : i32
    %c0_i32_0 = arith.constant 0 : i32
    %c0_i32_1 = arith.constant 0 : i32
    return %c0_i32, %c0_i32_0 : i32, i32
  }
  func.func @transform_10(%arg0: i32) -> (i32, i32) {
    %c0_i32 = arith.constant 0 : i32
    %c0_i32_0 = arith.constant 0 : i32
    %c0_i32_1 = arith.constant 0 : i32
    return %c0_i32, %c0_i32_0 : i32, i32
  }
  func.func @transform_11(%arg0: i32) -> (i32, i32) {
    %c0_i32 = arith.constant 0 : i32
    %c0_i32_0 = arith.constant 0 : i32
    return %arg0, %c0_i32 : i32, i32
  }
}

</mosaic_0001>

<bundles_post_ra>
// kernel: default_nn_forward.1
= control target key start
LH: loop header
LB: loop body
LE: loop exit
PB: predicated region body
PF: predicated region fallthrough
CT: control target
= control target key end

     0   :  { %v360_v0 = vmov 0.0   ;;  %vm361_vm0 = vmmov 0   ;;  %vm70_vm1 = vcmask 130048   ;;  %vm114_vm2 = vcmask 261120   ;;  %s478_s1 = inlined_call_operand.vmem [shape: bf16[16,32], index: 1, kind: input, shape index: {}]   ;;  %s479_s0 = inlined_call_operand.vmem [shape: f32[8,16], index: 0, kind: input, shape index: {}]   ;;  %s480_s2 = inlined_call_operand.vmem [shape: f32[1,32], index: 2, kind: input, shape index: {}]   ;;  %s481_s5 = inlined_call_operand.vmem [shape: bf16[32,32], index: 5, kind: input, shape index: {}]   ;;  %s482_s3 = inlined_call_operand.vmem [shape: f32[1,32], index: 3, kind: input, shape index: {}]   ;;  %s483_s4 = inlined_call_operand.vmem [shape: f32[1,32], index: 4, kind: input, shape index: {}]   ;;  %s484_s6 = inlined_call_operand.vmem [shape: f32[1,32], index: 6, kind: input, shape index: {}]   ;;  %s485_s9 = inlined_call_operand.vmem [shape: bf16[32,4], index: 9, kind: input, shape index: {}]   ;;  %s486_s7 = inlined_call_operand.vmem [shape: f32[1,32], index: 7, kind: input, shape index: {}]   ;;  %s487_s8 = inlined_call_operand.vmem [shape: f32[1,32], index: 8, kind: input, shape index: {}]   ;;  %s488_s10 = inlined_call_operand.vmem [shape: f32[1,4], index: 10, kind: input, shape index: {}]   ;;  %s489_s11 = inlined_call_operand.vmem [shape: f32[8,4], index: 11, kind: output, shape index: {}]  }
   0x1   :  { %325 = vmatprep.subr.bf16.mxu0 %v360_v0  ;;  %v349_v1 = vld [vmem:[%s478_s1] sm:$0xff]   ;;  %327 = vmatprep.mubr.msk.bf16.mxu0 %vm361_vm0, %v360_v0  ;;  %v351_v17 = vld [vmem:[%s481_s5 + $0x8] sm:$0xff]   ;;  %vm296_vm3 = vcmask 31744  }
   0x2   :  { %v56_v2 = vld [vmem:[%s479_s0] sm:$0xff]  ;;  %331 = vmatprep.subr.bf16.mxu1 %v360_v0  ;;  %335 = vmatprep.mubr.msk.bf16.mxu1 %vm361_vm0, %v360_v0  ;;  %v353_v42 = vld [vmem:[%s485_s9 + $0x8] sm:$0xff]  }
   0x3   :  { %326 = vmatpush3.bf16.msra.mxu0 %v349_v1  ;;  %v57_v3 = vpack.c.bf16 %v56_v2, %v56_v2  ;;  %v302_v4 = vld [vmem:[%s480_s2] ss:$0 sm:$0xff] }
   0x4   :  { %339 = vmatprep.subr.bf16.mxu0 %v360_v0  ;;  %v350_v16 = vld [vmem:[%s481_s5] sm:$0xff]  }
   0x5   :  { %332 = vmatpush3.bf16.msra.mxu1 %v350_v16  ;;  %v305_v22 = vld [vmem:[%s482_s3] ss:$0 sm:$0xff] }
   0x6   :  { %328 = vmatmul.mubr.msk.bf16.vlgmr.msra.gmra.mrb[0].mxu0 %vm70_vm1, %v57_v3  ;;  %333 = vmatprep.subr.bf16.mxu1 %v360_v0  ;;  %v306_v24 = vld [vmem:[%s483_s4] ss:$0 sm:$0xff] }
   0x7   :  { %343 = vmatprep.mubr.msk.bf16.mxu0 %vm361_vm0, %v360_v0  ;;  %v307_v29 = vld [vmem:[%s484_s6] ss:$0 sm:$0xff] }
   0x8   :  { %v352_v41 = vld [vmem:[%s485_s9] sm:$0xff]  }
   0x9   :  { %334 = vmatpush3.bf16.msra.mxu1 %v351_v17  ;;  %340 = vmatpush3.bf16.msra.mxu0 %v352_v41  ;;  %v311_v47 = vld [vmem:[%s486_s7] ss:$0 sm:$0xff] }
   0xa   :  { %341 = vmatprep.subr.bf16.mxu0 %v360_v0  ;;  %v312_v49 = vld [vmem:[%s487_s8] ss:$0 sm:$0xff] }
   0xb   :  { %v313_v54 = vld [vmem:[%s488_s10] ss:$0 sm:$0xff] }
   0xd   :  { %342 = vmatpush3.bf16.msra.mxu0 %v353_v42 }
  0xd9   :  { %v108_v5 = vpop.f32.mrb[0].mxu0 }
  0xda   :  { %v109_v6 = vadd.f32 %v302_v4, %v108_v5  ;;  %v329_v7 = vpop.f32.mrb[1].mxu0 }
  0xdb   :  { %v111_v8 = vpop.f32.mrb[2].mxu0 }
  0xdc   :  { %v330_v9 = vpop.f32.mrb[3].mxu0  ;;  %v115_v10 = vsel %vm114_vm2, %v109_v6, 0.0 }
  0xdd   :  { %116 = vadd.xlane.f32.xlu0 %v115_v10 }
 0x16a   :  { %v117_v11 = vpop.xlane.xlu0 %116 }
 0x16b   :  { %v118_v12 = vmul.f32 0.03125, %v117_v11 }
 0x16d   :  { %v119_v13 = vsub.f32 %v109_v6, %v118_v12 }
 0x16f   :  { %v120_v14 = vmul.f32 %v119_v13, %v119_v13 }
 0x171   :  { %v121_v15 = vsel %vm114_vm2, %v120_v14, 0.0 }
 0x172   :  { %122 = vadd.xlane.f32.xlu0 %v121_v15 }
 0x1ff   :  { %v123_v18 = vpop.xlane.xlu0 %122 }
 0x200   :  { %v124_v19 = vmul.f32 0.03125, %v123_v18 }
 0x202   :  { %v125_v20 = vadd.f32 1e-05, %v124_v19 }
 0x204   :  { %354 = vrsqrt.f32 %v125_v20 }
 0x20e   :  { %v355_v21 = vpop.eup %354 }
 0x20f   :  { %v127_v23 = vmul.f32 %v355_v21, %v119_v13 }
 0x211   :  { %v134_v25 = vmul.f32 %v305_v22, %v127_v23 }
 0x213   :  { %v141_v26 = vadd.f32 %v306_v24, %v134_v25 }
 0x215   :  { %v142_v27 = vmax.f32 %v141_v26, 0.0 }
 0x217   :  { %v143_v28 = vpack.c.bf16 %v142_v27, %v142_v27 }
 0x219   :  { %336 = vmatmul.mubr.msk.bf16.vlgmr.msra.gmra.mrb[0].mxu1 %vm114_vm2, %v143_v28 }
 0x2ec   :  { %v199_v30 = vpop.f32.mrb[0].mxu1 }
 0x2ed   :  { %v200_v31 = vadd.f32 %v307_v29, %v199_v30  ;;  %v337_v32 = vpop.f32.mrb[1].mxu1 }
 0x2ee   :  { %v202_v33 = vpop.f32.mrb[2].mxu1 }
 0x2ef   :  { %v338_v34 = vpop.f32.mrb[3].mxu1  ;;  %v205_v35 = vsel %vm114_vm2, %v200_v31, 0.0 }
 0x2f0   :  { %206 = vadd.xlane.f32.xlu1 %v205_v35 }
 0x37d   :  { %v207_v36 = vpop.xlane.xlu1 %206 }
 0x37e   :  { %v208_v37 = vmul.f32 0.03125, %v207_v36 }
 0x380   :  { %v209_v38 = vsub.f32 %v200_v31, %v208_v37 }
 0x382   :  { %v210_v39 = vmul.f32 %v209_v38, %v209_v38 }
 0x384   :  { %v211_v40 = vsel %vm114_vm2, %v210_v39, 0.0 }
 0x385   :  { %212 = vadd.xlane.f32.xlu1 %v211_v40 }
 0x412   :  { %v213_v43 = vpop.xlane.xlu1 %212 }
 0x413   :  { %v214_v44 = vmul.f32 0.03125, %v213_v43 }
 0x415   :  { %v215_v45 = vadd.f32 1e-05, %v214_v44 }
 0x417   :  { %356 = vrsqrt.f32 %v215_v45 }
 0x421   :  { %v357_v46 = vpop.eup %356 }
 0x422   :  { %v217_v48 = vmul.f32 %v357_v46, %v209_v38 }
 0x424   :  { %v224_v50 = vmul.f32 %v311_v47, %v217_v48 }
 0x426   :  { %v231_v51 = vadd.f32 %v312_v49, %v224_v50 }
 0x428   :  { %v232_v52 = vmax.f32 %v231_v51, 0.0 }
 0x42a   :  { %v233_v53 = vpack.c.bf16 %v232_v52, %v232_v52 }
 0x42c   :  { %344 = vmatmul.mubr.msk.bf16.vlgmr.msra.gmra.mrb[4].mxu0 %vm114_vm2, %v233_v53 }
 0x4ff   :  { %v289_v55 = vpop.f32.mrb[4].mxu0 }
 0x500   :  { %v290_v56 = vadd.f32 %v313_v54, %v289_v55  ;;  %v345_v57 = vpop.f32.mrb[5].mxu0 }
 0x501   :  { %v292_v58 = vpop.f32.mrb[6].mxu0 }
 0x502   :  { %358 = vtanh.f32 %v290_v56  ;;  %v346_v59 = vpop.f32.mrb[7].mxu0 }
 0x50c   :  { %v359_v60 = vpop.eup %358 }
 0x50d   :  { %297 = vst.msk [vmem:[%s489_s11] sm:$0xff] %vm296_vm3, %v359_v60 }

</bundles_post_ra>
